<compile_context>
chip_gen: v7x
topology: tpu7x:2x2x1
jax: 0.10.0
libtpu: 0.0.40
codegen_flags: <defaults>
</compile_context>

<pallas_src>
import functools

import jax
import jax.numpy as jnp
from jax import lax
from jax.experimental import pallas as pl
from jax.experimental.pallas import tpu as pltpu


_GROUP = 8  # rows per DMA-wait / compute group = one sublane tile


def _round_up(x, m):
    return (x + m - 1) // m * m


def _mix32(h):
    """murmur3 fmix32 avalanche on uint32 values (portable VPU integer ops)."""
    h = h ^ (h >> jnp.uint32(16))
    h = h * jnp.uint32(0x85EBCA6B)
    h = h ^ (h >> jnp.uint32(13))
    h = h * jnp.uint32(0xC2B2AE35)
    h = h ^ (h >> jnp.uint32(16))
    return h


def _pos_enc_kernel(seed_ref, idx_ref, tok_ref, pos_ref, out_ref,
                    gather_buf, *dma_sems,
                    resident, dropout_p, training, tile_t, c_pad):
    """One grid step = one (batch row, tile_t-row sequence chunk).

    resident=True : tok_ref is a full-array VMEM block; gather = dynamic slices.
    resident=False: tok_ref is a raw HBM ref; gather = per-row async DMAs,
                    issued all up front, waited one 8-row group at a time so
                    compute/store of group g overlaps the DMAs of groups > g.
    """
    b = pl.program_id(0)
    tc = pl.program_id(1)
    t0 = tc * tile_t                         # first sequence row of this chunk

    n_groups = tile_t // _GROUP
    apply_dropout = training and 0.0 < dropout_p < 1.0
    zero_all = training and dropout_p >= 1.0

    # ---- Phase 1 (HBM path): issue ALL row DMAs before any wait -----------
    # All SMEM id reads happen here, ahead of every .wait() (keeps the scalar
    # sst->sld forwarding path intact and fills the DMA descriptor queue).
    if not resident:
        sems = dma_sems[0]
        for g in range(n_groups):
            for r in range(_GROUP):
                t_loc = g * _GROUP + r
                row = idx_ref[b, t0 + t_loc]             # SMEM scalar read
                pltpu.make_async_copy(
                    tok_ref.at[pl.ds(row, 1)],           # (1, C_pad) HBM row
                    gather_buf.at[pl.ds(t_loc, 1)],      # (1, C_pad) VMEM slot
                    sems.at[g],                          # 8 rows share one sem
                ).start()

    # ---- dropout constants (hoisted out of the group loop) ----------------
    if apply_dropout:
        thr = jnp.uint32(min(int(dropout_p * 4294967296.0), 4294967295))
        scale = jnp.float32(1.0 / (1.0 - dropout_p))
        key = (seed_ref[0].astype(jnp.uint32) * jnp.uint32(0x9E3779B1)
               + b.astype(jnp.uint32) * jnp.uint32(0x85EBCA77)
               + tc.astype(jnp.uint32) * jnp.uint32(0xC2B2AE3D))
        r_iota = lax.broadcasted_iota(jnp.int32, (_GROUP, c_pad), 0).astype(jnp.uint32)
        c_iota = lax.broadcasted_iota(jnp.int32, (_GROUP, c_pad), 1).astype(jnp.uint32)
        tile_cnt = r_iota * jnp.uint32(c_pad) + c_iota   # element counter in a group

    # ---- Phase 2: per 8-row group: (gather-or-wait) + add + dropout + store
    for g in range(n_groups):
        lo = g * _GROUP

        if resident:
            # in-VMEM gather: dynamic sublane slice per row
            for r in range(_GROUP):
                row = idx_ref[b, t0 + lo + r]
                gather_buf[pl.ds(lo + r, 1), :] = tok_ref[pl.ds(row, 1), :]
        else:
            # one wait covers all _GROUP row copies signalled on sems[g];
            # DMAs for later groups keep flying while we compute this one.
            pltpu.make_async_copy(
                tok_ref.at[pl.ds(0, _GROUP)],            # shape/byte-count only
                gather_buf.at[pl.ds(lo, _GROUP)],
                sems.at[g],
            ).wait()

        vals = (gather_buf[pl.ds(lo, _GROUP), :].astype(jnp.float32)
                + pos_ref[pl.ds(lo, _GROUP), :].astype(jnp.float32))

        if zero_all:
            vals = jnp.zeros_like(vals)
        elif apply_dropout:
            h = _mix32(tile_cnt + jnp.uint32(lo * c_pad) + key)
            vals = jnp.where(h >= thr, vals * scale, 0.0)   # P(keep) = 1 - p

        out_ref[pl.ds(lo, _GROUP), :] = vals.astype(out_ref.dtype)


def positional_encoding(token_idx, tok_table, pos_table, *,
                        dropout_p=0.0, training=False, seed=0,
                        tile_t=128,
                        resident_table_bytes=4 * 1024 * 1024,
                        force_hbm_gather=False,
                        vmem_budget_bytes=48 * 1024 * 1024):
    """tok_table: (vocab_size, n_embd); pos_table: (block_size, n_embd)."""
    B, T = token_idx.shape
    V, C = tok_table.shape
    assert pos_table.shape[0] >= T and pos_table.shape[1] == C

    out_dtype = tok_table.dtype
    itemsize = jnp.dtype(out_dtype).itemsize

    # lane-dense embedding dim (plain vst stores, >=512 B row DMAs)
    c_pad = _round_up(C, 128)

    # sequence tiling (sublane aligned; one chunk per grid step)
    t_pad_min = _round_up(T, _GROUP)
    tile_t = max(_GROUP, _round_up(min(int(tile_t), t_pad_min), _GROUP))

    tok_bytes = V * c_pad * itemsize
    resident = (not force_hbm_gather) and tok_bytes <= resident_table_bytes
    if not resident:
        assert V >= _GROUP, "HBM gather path needs vocab_size >= 8"

    def _needed(tt):
        blk = tt * c_pad * itemsize
        need = 5 * blk                      # pos(2x) + out(2x) + gather scratch
        if resident:
            need += 2 * tok_bytes           # resident table (conservative 2x)
        return need

    # keep the per-step footprint bounded (v7x: 64 MiB VMEM per TensorCore)
    while _needed(tile_t) > vmem_budget_bytes and tile_t > _GROUP:
        tile_t = max(_GROUP, _round_up(tile_t // 2, _GROUP))

    t_pad = _round_up(T, tile_t)
    n_t = t_pad // tile_t
    n_groups = tile_t // _GROUP

    # host-side padding / clamping (padding sliced off on return)
    idx = jnp.clip(token_idx.astype(jnp.int32), 0, V - 1)   # no OOB DMAs
    if t_pad != T:
        idx = jnp.pad(idx, ((0, 0), (0, t_pad - T)))
    tok = tok_table if c_pad == C else jnp.pad(tok_table, ((0, 0), (0, c_pad - C)))
    pos = jnp.pad(pos_table[:T].astype(out_dtype),
                  ((0, t_pad - T), (0, c_pad - C)))
    seed_arr = jnp.array([seed], dtype=jnp.int32)

    kernel = functools.partial(_pos_enc_kernel,
                               resident=resident,
                               dropout_p=float(dropout_p),
                               training=bool(training),
                               tile_t=tile_t, c_pad=c_pad)

    if resident:
        tok_spec = pl.BlockSpec((V, c_pad), lambda b, t, seed, idx: (0, 0))
        scratch = [pltpu.VMEM((tile_t, c_pad), out_dtype)]
    else:
        tok_spec = pl.BlockSpec(memory_space=pl.ANY)         # table stays in HBM
        scratch = [pltpu.VMEM((tile_t, c_pad), out_dtype),
                   pltpu.SemaphoreType.DMA((n_groups,))]      # O(tile_t/8) sems

    grid_spec = pltpu.PrefetchScalarGridSpec(
        num_scalar_prefetch=2,                                # seed + token ids
        grid=(B, n_t),
        in_specs=[
            tok_spec,
            pl.BlockSpec((tile_t, c_pad), lambda b, t, seed, idx: (t, 0)),
        ],
        out_specs=pl.BlockSpec((None, tile_t, c_pad),
                               lambda b, t, seed, idx: (b, t, 0)),
        scratch_shapes=scratch,
    )

    vmem_limit = int(min(64 * 1024 * 1024,
                         max(16 * 1024 * 1024, _needed(tile_t) + (8 << 20))))

    out = pl.pallas_call(
        kernel,
        out_shape=jax.ShapeDtypeStruct((B, t_pad, c_pad), out_dtype),
        grid_spec=grid_spec,
        compiler_params=pltpu.CompilerParams(
            dimension_semantics=("parallel", "parallel"),     # megacore-friendly
            vmem_limit_bytes=vmem_limit),
    )(seed_arr, idx, tok, pos)

    return out[:, :T, :C]


if __name__ == "__main__":
    key = jax.random.PRNGKey(0)
    k_idx, k_tok, k_pos = jax.random.split(key, 3)

    # small config consistent with the module
    B, T = 2, 8
    vocab_size, block_size, n_embd = 64, 16, 32
    dropout = 0.1

    token_idx = jax.random.randint(k_idx, (B, T), 0, vocab_size, dtype=jnp.int32)
    tok_table = (0.02 * jax.random.normal(k_tok, (vocab_size, n_embd))).astype(jnp.float32)
    pos_table = (0.02 * jax.random.normal(k_pos, (block_size, n_embd))).astype(jnp.float32)

    # pure-JAX reference: embedding lookup + broadcast positional add
    ref = tok_table[token_idx] + pos_table[:T][None, :, :]

    # eval mode (dropout identity), small-vocab resident-table fast path
    out = positional_encoding(token_idx, tok_table, pos_table,
                              dropout_p=dropout, training=False)
    out = jax.block_until_ready(out)
    assert out.shape == (B, T, n_embd)
    assert jnp.allclose(out, ref, atol=1e-5, rtol=1e-5)

    # eval mode, forced HBM DMA-gather path (the production-vocab path)
    out_hbm = positional_encoding(token_idx, tok_table, pos_table,
                                  dropout_p=dropout, training=False,
                                  force_hbm_gather=True)
    out_hbm = jax.block_until_ready(out_hbm)
    assert jnp.allclose(out_hbm, ref, atol=1e-5, rtol=1e-5)

    # training mode: every element is either dropped (0) or kept and scaled by
    # 1/(1-p).  RNG stream differs from torch but is statistically equivalent
    # inverted dropout.
    out_tr = positional_encoding(token_idx, tok_table, pos_table,
                                 dropout_p=dropout, training=True, seed=123)
    out_tr = jax.block_until_ready(out_tr)
    scaled = ref / (1.0 - dropout)
    dropped = jnp.isclose(out_tr, 0.0, atol=1e-7)
    kept = jnp.isclose(out_tr, scaled, atol=1e-5, rtol=1e-5)
    assert out_tr.shape == (B, T, n_embd)
    assert bool(jnp.all(dropped | kept))
    n_drop = int(jnp.sum(dropped & ~kept))
    assert 0 < n_drop < out_tr.size // 2     # ~10% expected; generous bounds

    print("KERNEL_OK")
</pallas_src>

<mosaic_0001>
module attributes {stable_mosaic.version = 11 : i64} {
  func.func @_pos_enc_kernel(%arg0: i32, %arg1: i32, %arg2: memref<1xi32, #tpu.memory_space<smem>>, %arg3: memref<2x8xi32, #tpu.memory_space<smem>>, %arg4: memref<64x128xf32, #tpu.memory_space<vmem>>, %arg5: memref<8x128xf32, #tpu.memory_space<vmem>>, %arg6: memref<1x8x128xf32, #tpu.memory_space<vmem>>, %arg7: memref<8x128xf32, #tpu.memory_space<vmem>>) attributes {dimension_semantics = [#tpu.dimension_semantics<parallel>, #tpu.dimension_semantics<parallel>], iteration_bounds = array<i64: 2, 1>, scalar_prefetch = 2 : i64, scratch_operands = 1 : i64, tpu.core_type = #tpu.core_type<tc>, window_params = [{pipeline_mode = #tpu.pipeline_mode<synchronous>, transform_indices = @transform_0, window_bounds = array<i64: 64, 128>}, {transform_indices = @transform_1, window_bounds = array<i64: 8, 128>}, {transform_indices = @transform_2, window_bounds = array<i64: 1, 8, 128>}]} {
    %c8_i32 = arith.constant 8 : i32
    %0 = arith.muli %arg1, %c8_i32 : i32
    %c0_i32 = arith.constant 0 : i32
    %1 = arith.addi %0, %c0_i32 : i32
    %c0_i32_0 = arith.constant 0 : i32
    %2 = arith.addi %1, %c0_i32_0 : i32
    %3 = arith.index_cast %arg0 : i32 to index
    %4 = arith.index_cast %2 : i32 to index
    %5 = memref.load %arg3[%3, %4] : memref<2x8xi32, #tpu.memory_space<smem>>
    %6 = arith.index_cast %5 : i32 to index
    %c0 = arith.constant 0 : index
    %7 = vector.load %arg4[%6, %c0] : memref<64x128xf32, #tpu.memory_space<vmem>>, vector<1x128xf32>
    %c0_1 = arith.constant 0 : index
    %c0_2 = arith.constant 0 : index
    %8 = vector.load %arg7[%c0_1, %c0_2] : memref<8x128xf32, #tpu.memory_space<vmem>>, vector<1x128xf32>
    tpu.vector_store %arg7[%c0_1, %c0_2], %7 {strides = array<i32>} : memref<8x128xf32, #tpu.memory_space<vmem>>, vector<1x128xf32>,
    %c0_i32_3 = arith.constant 0 : i32
    %9 = arith.addi %0, %c0_i32_3 : i32
    %c1_i32 = arith.constant 1 : i32
    %10 = arith.addi %9, %c1_i32 : i32
    %11 = arith.index_cast %arg0 : i32 to index
    %12 = arith.index_cast %10 : i32 to index
    %13 = memref.load %arg3[%11, %12] : memref<2x8xi32, #tpu.memory_space<smem>>
    %14 = arith.index_cast %13 : i32 to index
    %c0_4 = arith.constant 0 : index
    %15 = vector.load %arg4[%14, %c0_4] : memref<64x128xf32, #tpu.memory_space<vmem>>, vector<1x128xf32>
    %c1 = arith.constant 1 : index
    %c0_5 = arith.constant 0 : index
    %16 = vector.load %arg7[%c1, %c0_5] : memref<8x128xf32, #tpu.memory_space<vmem>>, vector<1x128xf32>
    tpu.vector_store %arg7[%c1, %c0_5], %15 {strides = array<i32>} : memref<8x128xf32, #tpu.memory_space<vmem>>, vector<1x128xf32>,
    %c0_i32_6 = arith.constant 0 : i32
    %17 = arith.addi %0, %c0_i32_6 : i32
    %c2_i32 = arith.constant 2 : i32
    %18 = arith.addi %17, %c2_i32 : i32
    %19 = arith.index_cast %arg0 : i32 to index
    %20 = arith.index_cast %18 : i32 to index
    %21 = memref.load %arg3[%19, %20] : memref<2x8xi32, #tpu.memory_space<smem>>
    %22 = arith.index_cast %21 : i32 to index
    %c0_7 = arith.constant 0 : index
    %23 = vector.load %arg4[%22, %c0_7] : memref<64x128xf32, #tpu.memory_space<vmem>>, vector<1x128xf32>
    %c2 = arith.constant 2 : index
    %c0_8 = arith.constant 0 : index
    %24 = vector.load %arg7[%c2, %c0_8] : memref<8x128xf32, #tpu.memory_space<vmem>>, vector<1x128xf32>
    tpu.vector_store %arg7[%c2, %c0_8], %23 {strides = array<i32>} : memref<8x128xf32, #tpu.memory_space<vmem>>, vector<1x128xf32>,
    %c0_i32_9 = arith.constant 0 : i32
    %25 = arith.addi %0, %c0_i32_9 : i32
    %c3_i32 = arith.constant 3 : i32
    %26 = arith.addi %25, %c3_i32 : i32
    %27 = arith.index_cast %arg0 : i32 to index
    %28 = arith.index_cast %26 : i32 to index
    %29 = memref.load %arg3[%27, %28] : memref<2x8xi32, #tpu.memory_space<smem>>
    %30 = arith.index_cast %29 : i32 to index
    %c0_10 = arith.constant 0 : index
    %31 = vector.load %arg4[%30, %c0_10] : memref<64x128xf32, #tpu.memory_space<vmem>>, vector<1x128xf32>
    %c3 = arith.constant 3 : index
    %c0_11 = arith.constant 0 : index
    %32 = vector.load %arg7[%c3, %c0_11] : memref<8x128xf32, #tpu.memory_space<vmem>>, vector<1x128xf32>
    tpu.vector_store %arg7[%c3, %c0_11], %31 {strides = array<i32>} : memref<8x128xf32, #tpu.memory_space<vmem>>, vector<1x128xf32>,
    %c0_i32_12 = arith.constant 0 : i32
    %33 = arith.addi %0, %c0_i32_12 : i32
    %c4_i32 = arith.constant 4 : i32
    %34 = arith.addi %33, %c4_i32 : i32
    %35 = arith.index_cast %arg0 : i32 to index
    %36 = arith.index_cast %34 : i32 to index
    %37 = memref.load %arg3[%35, %36] : memref<2x8xi32, #tpu.memory_space<smem>>
    %38 = arith.index_cast %37 : i32 to index
    %c0_13 = arith.constant 0 : index
    %39 = vector.load %arg4[%38, %c0_13] : memref<64x128xf32, #tpu.memory_space<vmem>>, vector<1x128xf32>
    %c4 = arith.constant 4 : index
    %c0_14 = arith.constant 0 : index
    %40 = vector.load %arg7[%c4, %c0_14] : memref<8x128xf32, #tpu.memory_space<vmem>>, vector<1x128xf32>
    tpu.vector_store %arg7[%c4, %c0_14], %39 {strides = array<i32>} : memref<8x128xf32, #tpu.memory_space<vmem>>, vector<1x128xf32>,
    %c0_i32_15 = arith.constant 0 : i32
    %41 = arith.addi %0, %c0_i32_15 : i32
    %c5_i32 = arith.constant 5 : i32
    %42 = arith.addi %41, %c5_i32 : i32
    %43 = arith.index_cast %arg0 : i32 to index
    %44 = arith.index_cast %42 : i32 to index
    %45 = memref.load %arg3[%43, %44] : memref<2x8xi32, #tpu.memory_space<smem>>
    %46 = arith.index_cast %45 : i32 to index
    %c0_16 = arith.constant 0 : index
    %47 = vector.load %arg4[%46, %c0_16] : memref<64x128xf32, #tpu.memory_space<vmem>>, vector<1x128xf32>
    %c5 = arith.constant 5 : index
    %c0_17 = arith.constant 0 : index
    %48 = vector.load %arg7[%c5, %c0_17] : memref<8x128xf32, #tpu.memory_space<vmem>>, vector<1x128xf32>
    tpu.vector_store %arg7[%c5, %c0_17], %47 {strides = array<i32>} : memref<8x128xf32, #tpu.memory_space<vmem>>, vector<1x128xf32>,
    %c0_i32_18 = arith.constant 0 : i32
    %49 = arith.addi %0, %c0_i32_18 : i32
    %c6_i32 = arith.constant 6 : i32
    %50 = arith.addi %49, %c6_i32 : i32
    %51 = arith.index_cast %arg0 : i32 to index
    %52 = arith.index_cast %50 : i32 to index
    %53 = memref.load %arg3[%51, %52] : memref<2x8xi32, #tpu.memory_space<smem>>
    %54 = arith.index_cast %53 : i32 to index
    %c0_19 = arith.constant 0 : index
    %55 = vector.load %arg4[%54, %c0_19] : memref<64x128xf32, #tpu.memory_space<vmem>>, vector<1x128xf32>
    %c6 = arith.constant 6 : index
    %c0_20 = arith.constant 0 : index
    %56 = vector.load %arg7[%c6, %c0_20] : memref<8x128xf32, #tpu.memory_space<vmem>>, vector<1x128xf32>
    tpu.vector_store %arg7[%c6, %c0_20], %55 {strides = array<i32>} : memref<8x128xf32, #tpu.memory_space<vmem>>, vector<1x128xf32>,
    %c0_i32_21 = arith.constant 0 : i32
    %57 = arith.addi %0, %c0_i32_21 : i32
    %c7_i32 = arith.constant 7 : i32
    %58 = arith.addi %57, %c7_i32 : i32
    %59 = arith.index_cast %arg0 : i32 to index
    %60 = arith.index_cast %58 : i32 to index
    %61 = memref.load %arg3[%59, %60] : memref<2x8xi32, #tpu.memory_space<smem>>
    %62 = arith.index_cast %61 : i32 to index
    %c0_22 = arith.constant 0 : index
    %63 = vector.load %arg4[%62, %c0_22] : memref<64x128xf32, #tpu.memory_space<vmem>>, vector<1x128xf32>
    %c7 = arith.constant 7 : index
    %c0_23 = arith.constant 0 : index
    %64 = vector.load %arg7[%c7, %c0_23] : memref<8x128xf32, #tpu.memory_space<vmem>>, vector<1x128xf32>
    tpu.vector_store %arg7[%c7, %c0_23], %63 {strides = array<i32>} : memref<8x128xf32, #tpu.memory_space<vmem>>, vector<1x128xf32>,
    %c0_24 = arith.constant 0 : index
    %c0_25 = arith.constant 0 : index
    %65 = vector.load %arg7[%c0_24, %c0_25] : memref<8x128xf32, #tpu.memory_space<vmem>>, vector<8x128xf32>
    %c0_26 = arith.constant 0 : index
    %c0_27 = arith.constant 0 : index
    %66 = vector.load %arg5[%c0_26, %c0_27] : memref<8x128xf32, #tpu.memory_space<vmem>>, vector<8x128xf32>
    %67 = arith.addf %65, %66 : vector<8x128xf32>
    %c0_28 = arith.constant 0 : index
    %c0_29 = arith.constant 0 : index
    %c0_30 = arith.constant 0 : index
    %68 = vector.load %arg6[%c0_28, %c0_29, %c0_30] : memref<1x8x128xf32, #tpu.memory_space<vmem>>, vector<1x8x128xf32>
    %69 = vector.shape_cast %68 : vector<1x8x128xf32> to vector<8x128xf32>
    %70 = vector.shape_cast %67 : vector<8x128xf32> to vector<1x8x128xf32>
    tpu.vector_store %arg6[%c0_28, %c0_29, %c0_30], %70 {strides = array<i32>} : memref<1x8x128xf32, #tpu.memory_space<vmem>>, vector<1x8x128xf32>,
    return
  }
  func.func @transform_0(%arg0: i32, %arg1: i32, %arg2: memref<1xi32, #tpu.memory_space<smem>>, %arg3: memref<2x8xi32, #tpu.memory_space<smem>>) -> (i32, i32) {
    %c0_i32 = arith.constant 0 : i32
    %c0_i32_0 = arith.constant 0 : i32
    %c0_i32_1 = arith.constant 0 : i32
    return %c0_i32, %c0_i32_0 : i32, i32
  }
  func.func @transform_1(%arg0: i32, %arg1: i32, %arg2: memref<1xi32, #tpu.memory_space<smem>>, %arg3: memref<2x8xi32, #tpu.memory_space<smem>>) -> (i32, i32) {
    %c0_i32 = arith.constant 0 : i32
    %c0_i32_0 = arith.constant 0 : i32
    return %arg1, %c0_i32 : i32, i32
  }
  func.func @transform_2(%arg0: i32, %arg1: i32, %arg2: memref<1xi32, #tpu.memory_space<smem>>, %arg3: memref<2x8xi32, #tpu.memory_space<smem>>) -> (i32, i32, i32) {
    %c0_i32 = arith.constant 0 : i32
    %c0_i32_0 = arith.constant 0 : i32
    return %arg0, %arg1, %c0_i32 : i32, i32, i32
  }
}

</mosaic_0001>

<bundles_post_ra>
// kernel: tpu_custom_call.1
= control target key start
LH: loop header
LB: loop body
LE: loop exit
PB: predicated region body
PF: predicated region fallthrough
CT: control target
= control target key end

     0   :  { %s790_s0 = inlined_call_operand.<no memory space> [shape: s32[1], index: 0, kind: input, shape index: {}]   ;;  %s791_s1 = inlined_call_operand.vmem [shape: s32[2,8], index: 1, kind: input, shape index: {}]   ;;  %s792_s2 = inlined_call_operand.hbm [shape: f32[64,128], index: 2, kind: input, shape index: {}]   ;;  %s793_s3 = inlined_call_operand.vmem [shape: f32[8,128], index: 3, kind: input, shape index: {}]   ;;  %s794_s4 = inlined_call_operand.hbm [shape: f32[2,8,128], index: 4, kind: output, shape index: {}]  }
   0x1   :  { %s10_s17 = sshll.u32 %s791_s1, 4  ;;  %s11_s17 = int_to_ptr.vmem [resolvable:$true] %s10_s17 }
   0x2   :  { %s472_s18 = scalar_lea.vmem %s11_s17, 32  ;;  %p477_p1 = scmp.lt.s32.totalorder %s11_s17, %s11_s17 }
   0x3   :  { %p473_p0 = scmp.ne.s32.totalorder %s11_s17, %s472_s18  ;;  %p478_p2 = scmp.lt.s32.totalorder %s472_s18, %s472_s18 }
   0x5   :  { %p479_p3 = por %p478_p2, %p477_p1 }
   0x7   :  { %p480_p4 = pnand %p479_p3, %p473_p0 }
   0x9   :  { %483 = shalt.err (!%p480_p4)  }
   0xa   :  { %s598_s0 = smov [#allocation5]  }
   0xb   :  { %13 = dma.vmem_to_smem %s11_s17, 32, %s598_s0, [#allocation3] }
   0xc   :  { %564 = dma.done.wait [#allocation3], 32 }
   0xd   :  { %565 = vsyncadd [#allocation3], 4294967264 }
   0xe   :  { %15 = sfence }
   0xf   :  { %16 = vsyncpa [#allocation7], 0 }
  0x10   :  { %17 = vsyncpa [#allocation8], 0 }
  0x11   :  { %19 = vsyncpa [#allocation8 + $0x1], 0  ;;  %s631_s19 = smov 0   ;;  %s633_s20 = smov 0  }
  0x12   :  { %s635_s1 = smov 0   ;;  %s637_s21 = smov 0  }
  0x13   :  { %s639_s22 = smov 0   ;;  %s641_s23 = smov 0  }
  0x14 LB: > { %s383_s24 = sadd.s32 4294967295, %s596_s23   ;;  %s384_s25 = sadd.s32 4294967294, %s596_s23   ;;  %s596_s23 = sphi %s641_s23, %s25_s23   ;;  %s592_s22 = sphi %s639_s22, %s812_s22   ;;  %s588_s21 = sphi %s637_s21, %s811_s21   ;;  %s584_s1 = sphi %s635_s1, %s810_s1   ;;  %s580_s20 = sphi %s633_s20, %s809_s20   ;;  %s576_s19 = sphi %s631_s19, %s808_s19  }
  0x15   : > { %s37_s26 = sadd.s32 1, %s592_s22  ;;  %s93_s27 = sadd.s32 1, %s584_s1 }
  0x16   : > { %p39_p5 = scmp.ge.s32.totalorder %s37_s26, 2  ;;  %p103_p6 = scmp.ne.s32.totalorder %s584_s1, %s580_s20 }
  0x17   : > { %p104_p7 = scmp.eq.s32.totalorder %s383_s24, 1  ;;  %p109_p8 = scmp.ne.s32.totalorder %s580_s20, %s576_s19 }
  0x18   : > { %s814_s26 = smov (%p39_p5, %s37_s26), 0  ;;  %p110_p10 = scmp.eq.s32.totalorder %s384_s25, 1 }
  0x19   : > { %p671_p9 = por %p104_p7, %p103_p6  ;;  %s88_s29 = ssub.s32 %s592_s22, %s814_s26 }
  0x1a   : > { %p385_p11 = scmp.ge.s32.totalorder %s596_s23, 1  ;;  %p91_p12 = scmp.eq.s32.totalorder %s88_s29, 0 }
  0x1b   : > { %s799_s28 = scalar_select %p671_p9, 1, 0 }
  0x1c   : > { %p678_p13 = por %p110_p10, %p109_p8  ;;  %p117_p0 = scmp.lt.s32.totalorder %s596_s23, 3 }
  0x1d   : > { %s684_s5 = scalar_select %p91_p12, %s584_s1, %s93_s27  }
  0x1e   : > { %s800_s30 = scalar_select %p678_p13, 1, 0 }
  0x1f   : > { %p686_p1 = pnand %p385_p11, %p117_p0  ;;  %p690_p2 = scmp.eq.s32.totalorder %s383_s24, 0 }
  0x20   : > { %s599_s8 = smov [#allocation6]   ;;  %s484_s13 = scalar_lea.hbm %s792_s2, 1024 }
  0x21   : > { %s801_s6 = scalar_select %p686_p1, 1, 0 }
  0x22   : > { %s802_s7 = scalar_select %p690_p2, 1, 0 }
  0x23   : > { %p409_p3 = pneg %p686_p1  ;;  %s129_s9 = sshll.u32 %s599_s8, 4  ;;  %s130_s9 = int_to_ptr.vmem [resolvable:$true] %s129_s9 }
  0x24   : > { %p485_p5 = scmp.ne.s32.totalorder %s792_s2, %s484_s13  ;;  %p491_p10 = scmp.lt.u32.totalorder %s484_s13, %s792_s2 }
  0x25   : > { %p698_p4 = pnand %p690_p2, %p409_p3 }
  0x27   : > { %p486_p6 = pneg %p698_p4 }
  0x29   : > { %p487_p7 = pnand %p486_p6, %p485_p5 }
  0x2b   : > { %p488_p8 = pneg %p487_p7 }
  0x2d   : > { %p493_p11 = pnand %p491_p10, %p488_p8 }
  0x2f   : > { %496 = shalt.err (!%p493_p11)
}
  0x30   : > { %s497_s18 = scalar_lea.vmem %s130_s9, 1024  ;;  %p505_p13 = scmp.lt.s32.totalorder %s130_s9, %s130_s9 }
  0x31   : > { %p498_p12 = scmp.ne.s32.totalorder %s130_s9, %s497_s18  ;;  %p506_p9 = scmp.lt.s32.totalorder %s497_s18, %s497_s18 }
  0x33   : > { %p500_p0 = pnand %p498_p12, %p486_p6  ;;  %p507_p2 = por %p506_p9, %p505_p13 }
  0x35   : > { %p501_p3 = pneg %p500_p0 }
  0x37   : > { %p508_p1 = pnand %p507_p2, %p501_p3 }
  0x39   : > { %511 = shalt.err (!%p508_p1)
}
  0x3a   : > { %s600_s0 = smov 128   ;;  %s601_s24 = smov 8  }
  0x3b   : > { %412 = dma.hbm_to_vmem [thread:$0]  (!%p698_p4), %s792_s2, 1024, %s130_s9, [#allocation7], %s600_s0, %s600_s0, %s601_s24  }
  0x3c   : > { %p804_p5 = scmp.ne.s32.totalorder %s801_s6, 0 }
  0x3d   : > { %p805_p7 = scmp.ne.s32.totalorder (!%p804_p5), %s802_s7, 0 }
  0x3e   : > { %152 = sbr.rel (%p804_p5) target bundleno = 111 (0x6f), region = 28 }
  0x45   : > { %567 = dma.done.wait (%p805_p7), [#allocation7], 1024  }
  0x46   : > { %569 = vsyncadd (%p805_p7), [#allocation7], 4294966272  ;;  %s725_s29 = sshll.u32 %s588_s21, 7  ;;  %v274_v8 = vld [vmem:[%s793_s3] sm:$0xff]  ;;  %p806_p13 = scmp.ne.s32.totalorder %s799_s28, 0 }
  0x47   : > { %s185_s8 = sld [smem:[#allocation5 + %s725_s29]]  ;;  %s196_s6 = sadd.s32 1, %s725_s29 }
  0x48   : > { %s197_s9 = sld [smem:[#allocation5 + %s196_s6]]  ;;  %s208_s10 = sadd.s32 2, %s725_s29 }
  0x49   : > { %s209_s11 = sld [smem:[#allocation5 + %s208_s10]]  ;;  %s220_s12 = sadd.s32 3, %s725_s29 }
  0x4a   : > { %s221_s13 = sld [smem:[#allocation5 + %s220_s12]]  ;;  %s232_s7 = sadd.s32 4, %s725_s29 }
  0x4b   : > { %s233_s14 = sld [smem:[#allocation5 + %s232_s7]]  ;;  %s244_s15 = sadd.s32 5, %s725_s29 }
  0x4c   : > { %s245_s21 = sld [smem:[#allocation5 + %s244_s15]]  ;;  %s256_s16 = sadd.s32 6, %s725_s29 }
  0x4d   : > { %s257_s17 = sld [smem:[#allocation5 + %s256_s16]]  ;;  %s186_s18 = scalar_lea.vmem [#allocation6], %s185_s8 }
  0x4e   : > { %v187_v0 = vld [vmem:[%s186_s18] sm:$0x1]  ;;  %s268_s0 = sadd.s32 7, %s725_s29  ;;  %s198_s24 = scalar_lea.vmem [#allocation6], %s197_s9 }
  0x4f   : > { %188 = vst [vmem:[#allocation2] sm:$0x1] %v187_v0  ;;  %v199_v1 = vld [vmem:[%s198_s24] sm:$0x1]  ;;  %s269_s25 = sld [smem:[#allocation5 + %s268_s0]]  ;;  %s210_s27 = scalar_lea.vmem [#allocation6], %s209_s11 }
  0x50   : > { %200 = vst [vmem:[#allocation2 + $0x1] sm:$0x1] %v199_v1  ;;  %v211_v2 = vld [vmem:[%s210_s27] sm:$0x1]  ;;  %s222_s6 = scalar_lea.vmem [#allocation6], %s221_s13  ;;  %s170_s8 = sand.u32 1, %s580_s20  }
  0x51   : > { %212 = vst [vmem:[#allocation2 + $0x2] sm:$0x1] %v211_v2  ;;  %v223_v3 = vld [vmem:[%s222_s6] sm:$0x1]  ;;  %s234_s10 = scalar_lea.vmem [#allocation6], %s233_s14  ;;  %s390_s11 = sshll.u32 %s170_s8, 3 }
  0x52   : > { %224 = vst [vmem:[#allocation2 + $0x3] sm:$0x1] %v223_v3  ;;  %v235_v4 = vld [vmem:[%s234_s10] sm:$0x1]  ;;  %s246_s12 = scalar_lea.vmem [#allocation6], %s245_s21  ;;  %s172_s14 = scalar_lea.vmem [#allocation9], %s390_s11 }
  0x53   : > { %236 = vst [vmem:[#allocation2 + $0x4] sm:$0x1] %v235_v4  ;;  %v247_v5 = vld [vmem:[%s246_s12] sm:$0x1]  ;;  %s258_s7 = scalar_lea.vmem [#allocation6], %s257_s17  ;;  %s292_s16 = sshll.u32 %s172_s14, 4  ;;  %s739_s16 = int_to_ptr.vmem [resolvable:$true] %s292_s16 }
  0x54   : > { %248 = vst [vmem:[#allocation2 + $0x5] sm:$0x1] %v247_v5  ;;  %v259_v6 = vld [vmem:[%s258_s7] sm:$0x1]  ;;  %s745_s17 = scalar_lea.hbm %s794_s4, %s725_s29  ;;  %s278_s0 = scalar_lea.sflag [#allocation8], %s170_s8 }
  0x55   : > { %260 = vst [vmem:[#allocation2 + $0x6] sm:$0x1] %v259_v6  ;;  %s270_s9 = scalar_lea.vmem [#allocation6], %s269_s25  ;;  %s512_s24 = scalar_lea.vmem %s739_s16, 128 }
  0x56   : > { %v271_v7 = vld [vmem:[%s270_s9] sm:$0x1]  ;;  %p513_p9 = scmp.ne.s32.totalorder %s739_s16, %s512_s24  ;;  %s602_s25 = smov [#allocation9]  }
  0x57   : > { %272 = vst [vmem:[#allocation2 + $0x7] sm:$0x1] %v271_v7  ;;  %s516_s27 = sshll.u32 %s602_s25, 4  ;;  %s517_s27 = int_to_ptr.vmem [resolvable:$false] %s516_s27 }
  0x58   : > { %p514_p1 = pnand %p513_p9, %p806_p13  ;;  %s518_s6 = scalar_lea.vmem %s517_s27, 256 }
  0x59   : > { %p519_p4 = scmp.lt.s32.totalorder %s739_s16, %s517_s27  ;;  %p520_p6 = scmp.lt.s32.totalorder %s518_s6, %s512_s24 }
  0x5a   : > { %p515_p2 = pneg %p514_p1 }
  0x5b   : > { %p521_p8 = por %p520_p6, %p519_p4 }
  0x5d   : > { %p522_p10 = pnand %p521_p8, %p515_p2 }
  0x5e   : > { %v273_v9 = vld [vmem:[#allocation2] sm:$0xff] }
  0x5f   : > { %v275_v10 = vadd.f32 %v274_v8, %v273_v9 }
  0x61   : > { %276 = vst [vmem:[%s172_s14] sm:$0xff] %v275_v10 }
  0x62   : > { %525 = shalt.err (!%p522_p10)
}
  0x63   : > { %s526_s29 = scalar_lea.hbm %s745_s17, 128  ;;  %s530_s8 = scalar_lea.hbm %s794_s4, 256 }
  0x64   : > { %p527_p11 = scmp.ne.s32.totalorder %s745_s17, %s526_s29  ;;  %p531_p3 = scmp.lt.u32.totalorder %s745_s17, %s794_s4 }
  0x65   : > { %p532_p5 = scmp.lt.u32.totalorder %s530_s8, %s526_s29  ;;  %p534_p9 = scmp.lt.u32.totalorder %s526_s29, %s745_s17 }
  0x66   : > { %p528_p12 = pnand %p527_p11, %p806_p13 }
  0x67   : > { %p533_p7 = por %p532_p5, %p531_p3 }
  0x68   : > { %p529_p0 = pneg %p528_p12 }
  0x69   : > { %p535_p1 = por %p534_p9, %p533_p7 }
  0x6b   : > { %p536_p2 = pnand %p535_p1, %p529_p0 }
  0x6d   : > { %539 = shalt.err (!%p536_p2)
}
  0x6e   : > { %407 = dma.vmem_to_hbm [thread:$0]  (%p806_p13), %s739_s16, 128, %s745_s17, %s278_s0  }
  0x6f PF: > { %p419_p4 = scmp.ge.s32.totalorder %s596_s23, 2  ;;  %s304_s11 = sand.u32 1, %s576_s19  }
  0x70   : > { %p807_p6 = scmp.ne.s32.totalorder %s800_s30, 0  ;;  %s305_s15 = scalar_lea.sflag [#allocation8], %s304_s11 }
  0x72   : > { %p414_p8 = pnand %p419_p4, %p807_p6 }
  0x74   : > { %571 = dma.done.wait (!%p414_p8), %s305_s15, 128  }
  0x75   : > { %573 = vsyncadd (!%p414_p8), %s305_s15, 4294967168  ;;  %s25_s23 = sadd.s32 1, %s596_s23   ;;  %s808_s19 = smov %s580_s20 }
  0x76   : > { %p22_p10 = scmp.ge.s32.totalorder %s25_s23, 4   ;;  %s809_s20 = smov %s584_s1 }
  0x77   : > { %s810_s1 = smov %s684_s5  ;;  %s811_s21 = smov %s592_s22 }
  0x78   : > { %s812_s22 = smov %s814_s26  ;;  %24 = sbr.rel (!%p22_p10) target bundleno = 20 (0x14), region = 76 }
  0x7f   :  { %310 = vsyncpa [#allocation7], 1 }
  0x80   :  { %312 = vsyncpa [#allocation7 + $0x1], 1 }
  0x81   :  { %313 = vsyncpa [#allocation8], 1 }
  0x82   :  { %315 = vsyncpa [#allocation8 + $0x1], 1 }

</bundles_post_ra>
